<compile_context>
chip_gen: v7x
topology: tpu7x:2x2x1
jax: 0.10.0
libtpu: 0.0.40
codegen_flags: <defaults>
</compile_context>

<pallas_src>
import functools

import jax
import jax.numpy as jnp
from jax import lax
from jax.experimental import pallas as pl
from jax.experimental.pallas import tpu as pltpu


def mha_kernel(x_ref, kw_ref, qw_ref, vw_ref, wp_ref, o_ref, *,
               embed_dim, head_size, num_heads):
    E, hs, NH = embed_dim, head_size, num_heads
    T = x_ref.shape[1]

    # Supernet embed slice folded into the kernel (tiny VMEM-level slice).
    xs = x_ref[0][:, :E]                                   # (T, E), native dtype

    # Load stacked head weights once, slice statically per head.
    kw_full = kw_ref[...]                                  # (NH, HSf, C)
    qw_full = qw_ref[...]
    vw_full = vw_ref[...]

    # Fused QKV weight: [K_0..K_{NH-1} | Q_0..Q_{NH-1} | V_0..V_{NH-1}].
    w_parts = ([kw_full[h, :hs, :E] for h in range(NH)]
               + [qw_full[h, :hs, :E] for h in range(NH)]
               + [vw_full[h, :hs, :E] for h in range(NH)])
    w_all = jnp.concatenate(w_parts, axis=0)               # (3*NH*hs, E)

    dn_nt = (((1,), (1,)), ((), ()))      # a @ b.T  (contract last dims)
    dn_nn = (((1,), (0,)), ((), ()))      # a @ b

    # One MXU matmul produces K, Q, V for every head (f32 accumulation).
    qkv = lax.dot_general(xs, w_all, dn_nt,
                          preferred_element_type=jnp.float32)  # (T, 3*NH*hs)
    blk = NH * hs
    k_all = qkv[:, :blk]
    q_all = qkv[:, blk:2 * blk]
    v_all = qkv[:, 2 * blk:3 * blk]

    # Causal mask built in-kernel (no extra HBM input for `tril`).
    row = lax.broadcasted_iota(jnp.int32, (T, T), 0)
    col = lax.broadcasted_iota(jnp.int32, (T, T), 1)
    causal = row >= col
    scale = float(hs) ** -0.5

    head_outs = []
    for h in range(NH):                   # static unrolled loop, NH is small
        k = k_all[:, h * hs:(h + 1) * hs]
        q = q_all[:, h * hs:(h + 1) * hs]
        v = v_all[:, h * hs:(h + 1) * hs]

        s = lax.dot_general(q, k, dn_nt,
                            preferred_element_type=jnp.float32) * scale  # (T, T)
        s = jnp.where(causal, s, jnp.float32(-jnp.inf))
        m = jnp.max(s, axis=-1, keepdims=True)
        p = jnp.exp(s - m)
        p = p / jnp.sum(p, axis=-1, keepdims=True)          # Dropout(0.0) = identity
        head_outs.append(
            lax.dot_general(p, v, dn_nn, preferred_element_type=jnp.float32))

    out_cat = jnp.concatenate(head_outs, axis=-1)[:, :E]    # (T, E)

    # Output projection: out_cat @ Wp[:E, :E].T (bias_proj=False).
    wp = wp_ref[...][:E, :E]
    y = lax.dot_general(out_cat, wp, dn_nt, preferred_element_type=jnp.float32)
    # Dropout(p=0.0) is the identity.
    o_ref[0] = y.astype(o_ref.dtype)


def multi_head_attention_pallas(x, kw_all, qw_all, vw_all, wp,
                                embed_dim, head_size):
    """x: (B, T, C_full); k/q/v weights: (NH, HS_full, C_full); wp: (C_full, C_full)."""
    B, T, C = x.shape
    NH, HSf, _ = kw_all.shape
    E, hs = embed_dim, head_size
    assert hs <= HSf and E <= C
    # PyTorch's F.linear on the concat slice requires NH*hs >= E.
    assert NH * hs >= E

    kernel = functools.partial(mha_kernel, embed_dim=E, head_size=hs,
                               num_heads=NH)
    return pl.pallas_call(
        kernel,
        out_shape=jax.ShapeDtypeStruct((B, T, E), x.dtype),
        grid_spec=pltpu.PrefetchScalarGridSpec(
            num_scalar_prefetch=0,
            grid=(B,),
            in_specs=[
                pl.BlockSpec((1, T, C), lambda b: (b, 0, 0)),      # x row
                pl.BlockSpec((NH, HSf, C), lambda b: (0, 0, 0)),   # resident weights
                pl.BlockSpec((NH, HSf, C), lambda b: (0, 0, 0)),
                pl.BlockSpec((NH, HSf, C), lambda b: (0, 0, 0)),
                pl.BlockSpec((C, C), lambda b: (0, 0)),
            ],
            out_specs=pl.BlockSpec((1, T, E), lambda b: (b, 0, 0)),
        ),
        compiler_params=pltpu.CompilerParams(
            dimension_semantics=("parallel",),
            vmem_limit_bytes=32 << 20,
        ),
    )(x, kw_all, qw_all, vw_all, wp)


def multi_head_attention_ref(x, kw_all, qw_all, vw_all, wp, embed_dim, head_size):
    """Pure-JAX reference matching the PyTorch module (bias=False, dropout=0.0)."""
    E, hs = embed_dim, head_size
    NH = kw_all.shape[0]
    B, T, _ = x.shape
    xs = x[:, :, :E].astype(jnp.float32)
    mask = jnp.tril(jnp.ones((T, T), dtype=bool))
    outs = []
    for h in range(NH):
        kw = kw_all[h, :hs, :E].astype(jnp.float32)
        qw = qw_all[h, :hs, :E].astype(jnp.float32)
        vw = vw_all[h, :hs, :E].astype(jnp.float32)
        k = xs @ kw.T
        q = xs @ qw.T
        v = xs @ vw.T
        wei = (q @ jnp.swapaxes(k, -1, -2)) * (hs ** -0.5)
        wei = jnp.where(mask, wei, -jnp.inf)
        wei = jax.nn.softmax(wei, axis=-1)
        outs.append(wei @ v)
    out_cat = jnp.concatenate(outs, axis=-1)[:, :, :E]
    y = out_cat @ wp[:E, :E].astype(jnp.float32).T
    return y.astype(x.dtype)


if __name__ == "__main__":
    # Supernet config: full n_embd=48, num_heads=4 (full head_size=12),
    # chosen embed_dim=32, chosen head_size=8, bias=False, dropout=0.0.
    n_embd_full = 48
    num_heads = 4
    head_size_full = n_embd_full // num_heads   # 12
    embed_dim = 32
    head_size = 8
    B, T = 2, 8                                  # T <= block_size (64)

    key = jax.random.PRNGKey(0)
    kx, kk, kq, kv, kp = jax.random.split(key, 5)
    x = jax.random.normal(kx, (B, T, n_embd_full), dtype=jnp.float32)
    # nn.Linear-shaped (out, in) weights, stacked over heads.
    kw_all = 0.02 * jax.random.normal(kk, (num_heads, head_size_full, n_embd_full),
                                      dtype=jnp.float32)
    qw_all = 0.02 * jax.random.normal(kq, (num_heads, head_size_full, n_embd_full),
                                      dtype=jnp.float32)
    vw_all = 0.02 * jax.random.normal(kv, (num_heads, head_size_full, n_embd_full),
                                      dtype=jnp.float32)
    wp = 0.02 * jax.random.normal(kp, (n_embd_full, n_embd_full), dtype=jnp.float32)

    out = multi_head_attention_pallas(x, kw_all, qw_all, vw_all, wp,
                                      embed_dim, head_size)
    out = jax.block_until_ready(out)

    ref = multi_head_attention_ref(x, kw_all, qw_all, vw_all, wp,
                                   embed_dim, head_size)
    assert out.shape == (B, T, embed_dim), out.shape
    err = float(jnp.abs(out - ref).max())
    # Tolerance accounts for TPU default-precision matmul pass differences
    # between the Mosaic kernel and the XLA reference.
    assert jnp.allclose(out, ref, atol=2e-4, rtol=2e-3), err

    print("KERNEL_OK")
</pallas_src>

<mosaic_0001>
module attributes {stable_mosaic.version = 11 : i64} {
  func.func @mha_kernel(%arg0: i32, %arg1: memref<1x8x48xf32, #tpu.memory_space<vmem>>, %arg2: memref<4x12x48xf32, #tpu.memory_space<vmem>>, %arg3: memref<4x12x48xf32, #tpu.memory_space<vmem>>, %arg4: memref<4x12x48xf32, #tpu.memory_space<vmem>>, %arg5: memref<48x48xf32, #tpu.memory_space<vmem>>, %arg6: memref<1x8x32xf32, #tpu.memory_space<vmem>>) attributes {dimension_semantics = [#tpu.dimension_semantics<parallel>], iteration_bounds = array<i64: 2>, scalar_prefetch = 0 : i64, scratch_operands = 0 : i64, tpu.core_type = #tpu.core_type<tc>, window_params = [{transform_indices = @transform_0, window_bounds = array<i64: 1, 8, 48>}, {pipeline_mode = #tpu.pipeline_mode<synchronous>, transform_indices = @transform_1, window_bounds = array<i64: 4, 12, 48>}, {pipeline_mode = #tpu.pipeline_mode<synchronous>, transform_indices = @transform_2, window_bounds = array<i64: 4, 12, 48>}, {pipeline_mode = #tpu.pipeline_mode<synchronous>, transform_indices = @transform_3, window_bounds = array<i64: 4, 12, 48>}, {pipeline_mode = #tpu.pipeline_mode<synchronous>, transform_indices = @transform_4, window_bounds = array<i64: 48, 48>}, {transform_indices = @transform_5, window_bounds = array<i64: 1, 8, 32>}]} {
    %c0 = arith.constant 0 : index
    %c0_0 = arith.constant 0 : index
    %c0_1 = arith.constant 0 : index
    %0 = vector.load %arg1[%c0, %c0_0, %c0_1] : memref<1x8x48xf32, #tpu.memory_space<vmem>>, vector<1x8x48xf32>
    %1 = vector.shape_cast %0 : vector<1x8x48xf32> to vector<8x48xf32>
    %2 = vector.extract_strided_slice %1 {offsets = [0, 0], sizes = [8, 32], strides = [1, 1]} : vector<8x48xf32> to vector<8x32xf32>
    %c0_2 = arith.constant 0 : index
    %c0_3 = arith.constant 0 : index
    %c0_4 = arith.constant 0 : index
    %3 = vector.load %arg2[%c0_2, %c0_3, %c0_4] : memref<4x12x48xf32, #tpu.memory_space<vmem>>, vector<4x12x48xf32>
    %c0_5 = arith.constant 0 : index
    %c0_6 = arith.constant 0 : index
    %c0_7 = arith.constant 0 : index
    %4 = vector.load %arg3[%c0_5, %c0_6, %c0_7] : memref<4x12x48xf32, #tpu.memory_space<vmem>>, vector<4x12x48xf32>
    %c0_8 = arith.constant 0 : index
    %c0_9 = arith.constant 0 : index
    %c0_10 = arith.constant 0 : index
    %5 = vector.load %arg4[%c0_8, %c0_9, %c0_10] : memref<4x12x48xf32, #tpu.memory_space<vmem>>, vector<4x12x48xf32>
    %6 = vector.extract_strided_slice %3 {offsets = [0, 0, 0], sizes = [1, 8, 32], strides = [1, 1, 1]} : vector<4x12x48xf32> to vector<1x8x32xf32>
    %7 = vector.shape_cast %6 : vector<1x8x32xf32> to vector<8x32xf32>
    %8 = vector.extract_strided_slice %3 {offsets = [1, 0, 0], sizes = [1, 8, 32], strides = [1, 1, 1]} : vector<4x12x48xf32> to vector<1x8x32xf32>
    %9 = vector.shape_cast %8 : vector<1x8x32xf32> to vector<8x32xf32>
    %10 = vector.extract_strided_slice %3 {offsets = [2, 0, 0], sizes = [1, 8, 32], strides = [1, 1, 1]} : vector<4x12x48xf32> to vector<1x8x32xf32>
    %11 = vector.shape_cast %10 : vector<1x8x32xf32> to vector<8x32xf32>
    %12 = vector.extract_strided_slice %3 {offsets = [3, 0, 0], sizes = [1, 8, 32], strides = [1, 1, 1]} : vector<4x12x48xf32> to vector<1x8x32xf32>
    %13 = vector.shape_cast %12 : vector<1x8x32xf32> to vector<8x32xf32>
    %14 = vector.extract_strided_slice %4 {offsets = [0, 0, 0], sizes = [1, 8, 32], strides = [1, 1, 1]} : vector<4x12x48xf32> to vector<1x8x32xf32>
    %15 = vector.shape_cast %14 : vector<1x8x32xf32> to vector<8x32xf32>
    %16 = vector.extract_strided_slice %4 {offsets = [1, 0, 0], sizes = [1, 8, 32], strides = [1, 1, 1]} : vector<4x12x48xf32> to vector<1x8x32xf32>
    %17 = vector.shape_cast %16 : vector<1x8x32xf32> to vector<8x32xf32>
    %18 = vector.extract_strided_slice %4 {offsets = [2, 0, 0], sizes = [1, 8, 32], strides = [1, 1, 1]} : vector<4x12x48xf32> to vector<1x8x32xf32>
    %19 = vector.shape_cast %18 : vector<1x8x32xf32> to vector<8x32xf32>
    %20 = vector.extract_strided_slice %4 {offsets = [3, 0, 0], sizes = [1, 8, 32], strides = [1, 1, 1]} : vector<4x12x48xf32> to vector<1x8x32xf32>
    %21 = vector.shape_cast %20 : vector<1x8x32xf32> to vector<8x32xf32>
    %22 = vector.extract_strided_slice %5 {offsets = [0, 0, 0], sizes = [1, 8, 32], strides = [1, 1, 1]} : vector<4x12x48xf32> to vector<1x8x32xf32>
    %23 = vector.shape_cast %22 : vector<1x8x32xf32> to vector<8x32xf32>
    %24 = vector.extract_strided_slice %5 {offsets = [1, 0, 0], sizes = [1, 8, 32], strides = [1, 1, 1]} : vector<4x12x48xf32> to vector<1x8x32xf32>
    %25 = vector.shape_cast %24 : vector<1x8x32xf32> to vector<8x32xf32>
    %26 = vector.extract_strided_slice %5 {offsets = [2, 0, 0], sizes = [1, 8, 32], strides = [1, 1, 1]} : vector<4x12x48xf32> to vector<1x8x32xf32>
    %27 = vector.shape_cast %26 : vector<1x8x32xf32> to vector<8x32xf32>
    %28 = vector.extract_strided_slice %5 {offsets = [3, 0, 0], sizes = [1, 8, 32], strides = [1, 1, 1]} : vector<4x12x48xf32> to vector<1x8x32xf32>
    %29 = vector.shape_cast %28 : vector<1x8x32xf32> to vector<8x32xf32>
    %30 = tpu.concatenate %7, %9, %11, %13, %15, %17, %19, %21, %23, %25, %27, %29 in 0 : vector<8x32xf32>, vector<8x32xf32>, vector<8x32xf32>, vector<8x32xf32>, vector<8x32xf32>, vector<8x32xf32>, vector<8x32xf32>, vector<8x32xf32>, vector<8x32xf32>, vector<8x32xf32>, vector<8x32xf32>, vector<8x32xf32> -> vector<96x32xf32>
    %cst = arith.constant dense<0.000000e+00> : vector<8x96xf32>
    %31 = tpu.matmul %2, %30, %cst {dimension_numbers = #tpu.dot_dimension_numbers<[1], [1], [0], [0], [0, 0, 1, 0], [], []>} : vector<8x32xf32>, vector<96x32xf32>, vector<8x96xf32> -> vector<8x96xf32>
    %32 = vector.extract_strided_slice %31 {offsets = [0, 0], sizes = [8, 32], strides = [1, 1]} : vector<8x96xf32> to vector<8x32xf32>
    %33 = vector.extract_strided_slice %31 {offsets = [0, 32], sizes = [8, 32], strides = [1, 1]} : vector<8x96xf32> to vector<8x32xf32>
    %34 = vector.extract_strided_slice %31 {offsets = [0, 64], sizes = [8, 32], strides = [1, 1]} : vector<8x96xf32> to vector<8x32xf32>
    %35 = tpu.iota {dimensions = array<i32: 0>} : vector<8x8xi32>
    %36 = tpu.iota {dimensions = array<i32: 1>} : vector<8x8xi32>
    %37 = arith.cmpi sge, %35, %36 : vector<8x8xi32>
    %38 = vector.extract_strided_slice %32 {offsets = [0, 0], sizes = [8, 8], strides = [1, 1]} : vector<8x32xf32> to vector<8x8xf32>
    %39 = vector.extract_strided_slice %33 {offsets = [0, 0], sizes = [8, 8], strides = [1, 1]} : vector<8x32xf32> to vector<8x8xf32>
    %40 = vector.extract_strided_slice %34 {offsets = [0, 0], sizes = [8, 8], strides = [1, 1]} : vector<8x32xf32> to vector<8x8xf32>
    %cst_11 = arith.constant dense<0.000000e+00> : vector<8x8xf32>
    %41 = tpu.matmul %39, %38, %cst_11 {dimension_numbers = #tpu.dot_dimension_numbers<[1], [1], [0], [0], [0, 0, 1, 0], [], []>} : vector<8x8xf32>, vector<8x8xf32>, vector<8x8xf32> -> vector<8x8xf32>
    %cst_12 = arith.constant 0.353553385 : f32
    %42 = vector.broadcast %cst_12 : f32 to vector<8x8xf32>
    %43 = arith.mulf %41, %42 : vector<8x8xf32>
    %cst_13 = arith.constant 0xFF800000 : f32
    %44 = vector.broadcast %cst_13 : f32 to vector<8x8xf32>
    %45 = arith.select %37, %43, %44 : vector<8x8xi1>, vector<8x8xf32>
    %cst_14 = arith.constant dense<0xFF800000> : vector<8xf32>
    %46 = vector.multi_reduction <maximumf>, %45, %cst_14 [1] : vector<8x8xf32> to vector<8xf32>
    %47 = vector.shape_cast %46 : vector<8xf32> to vector<8x1xf32>
    %48 = vector.broadcast %47 : vector<8x1xf32> to vector<8x8xf32>
    %49 = arith.subf %45, %48 : vector<8x8xf32>
    %50 = math.exp %49 : vector<8x8xf32>
    %cst_15 = arith.constant dense<0.000000e+00> : vector<8xf32>
    %51 = vector.multi_reduction <add>, %50, %cst_15 [1] : vector<8x8xf32> to vector<8xf32>
    %52 = vector.shape_cast %51 : vector<8xf32> to vector<8x1xf32>
    %53 = vector.broadcast %52 : vector<8x1xf32> to vector<8x8xf32>
    %54 = arith.divf %50, %53 : vector<8x8xf32>
    %cst_16 = arith.constant dense<0.000000e+00> : vector<8x8xf32>
    %55 = tpu.matmul %54, %40, %cst_16 {dimension_numbers = #tpu.dot_dimension_numbers<[1], [0], [0], [1], [0, 0, 1, 1], [], []>} : vector<8x8xf32>, vector<8x8xf32>, vector<8x8xf32> -> vector<8x8xf32>
    %56 = vector.extract_strided_slice %32 {offsets = [0, 8], sizes = [8, 8], strides = [1, 1]} : vector<8x32xf32> to vector<8x8xf32>
    %57 = vector.extract_strided_slice %33 {offsets = [0, 8], sizes = [8, 8], strides = [1, 1]} : vector<8x32xf32> to vector<8x8xf32>
    %58 = vector.extract_strided_slice %34 {offsets = [0, 8], sizes = [8, 8], strides = [1, 1]} : vector<8x32xf32> to vector<8x8xf32>
    %cst_17 = arith.constant dense<0.000000e+00> : vector<8x8xf32>
    %59 = tpu.matmul %57, %56, %cst_17 {dimension_numbers = #tpu.dot_dimension_numbers<[1], [1], [0], [0], [0, 0, 1, 0], [], []>} : vector<8x8xf32>, vector<8x8xf32>, vector<8x8xf32> -> vector<8x8xf32>
    %cst_18 = arith.constant 0.353553385 : f32
    %60 = vector.broadcast %cst_18 : f32 to vector<8x8xf32>
    %61 = arith.mulf %59, %60 : vector<8x8xf32>
    %cst_19 = arith.constant 0xFF800000 : f32
    %62 = vector.broadcast %cst_19 : f32 to vector<8x8xf32>
    %63 = arith.select %37, %61, %62 : vector<8x8xi1>, vector<8x8xf32>
    %cst_20 = arith.constant dense<0xFF800000> : vector<8xf32>
    %64 = vector.multi_reduction <maximumf>, %63, %cst_20 [1] : vector<8x8xf32> to vector<8xf32>
    %65 = vector.shape_cast %64 : vector<8xf32> to vector<8x1xf32>
    %66 = vector.broadcast %65 : vector<8x1xf32> to vector<8x8xf32>
    %67 = arith.subf %63, %66 : vector<8x8xf32>
    %68 = math.exp %67 : vector<8x8xf32>
    %cst_21 = arith.constant dense<0.000000e+00> : vector<8xf32>
    %69 = vector.multi_reduction <add>, %68, %cst_21 [1] : vector<8x8xf32> to vector<8xf32>
    %70 = vector.shape_cast %69 : vector<8xf32> to vector<8x1xf32>
    %71 = vector.broadcast %70 : vector<8x1xf32> to vector<8x8xf32>
    %72 = arith.divf %68, %71 : vector<8x8xf32>
    %cst_22 = arith.constant dense<0.000000e+00> : vector<8x8xf32>
    %73 = tpu.matmul %72, %58, %cst_22 {dimension_numbers = #tpu.dot_dimension_numbers<[1], [0], [0], [1], [0, 0, 1, 1], [], []>} : vector<8x8xf32>, vector<8x8xf32>, vector<8x8xf32> -> vector<8x8xf32>
    %74 = vector.extract_strided_slice %32 {offsets = [0, 16], sizes = [8, 8], strides = [1, 1]} : vector<8x32xf32> to vector<8x8xf32>
    %75 = vector.extract_strided_slice %33 {offsets = [0, 16], sizes = [8, 8], strides = [1, 1]} : vector<8x32xf32> to vector<8x8xf32>
    %76 = vector.extract_strided_slice %34 {offsets = [0, 16], sizes = [8, 8], strides = [1, 1]} : vector<8x32xf32> to vector<8x8xf32>
    %cst_23 = arith.constant dense<0.000000e+00> : vector<8x8xf32>
    %77 = tpu.matmul %75, %74, %cst_23 {dimension_numbers = #tpu.dot_dimension_numbers<[1], [1], [0], [0], [0, 0, 1, 0], [], []>} : vector<8x8xf32>, vector<8x8xf32>, vector<8x8xf32> -> vector<8x8xf32>
    %cst_24 = arith.constant 0.353553385 : f32
    %78 = vector.broadcast %cst_24 : f32 to vector<8x8xf32>
    %79 = arith.mulf %77, %78 : vector<8x8xf32>
    %cst_25 = arith.constant 0xFF800000 : f32
    %80 = vector.broadcast %cst_25 : f32 to vector<8x8xf32>
    %81 = arith.select %37, %79, %80 : vector<8x8xi1>, vector<8x8xf32>
    %cst_26 = arith.constant dense<0xFF800000> : vector<8xf32>
    %82 = vector.multi_reduction <maximumf>, %81, %cst_26 [1] : vector<8x8xf32> to vector<8xf32>
    %83 = vector.shape_cast %82 : vector<8xf32> to vector<8x1xf32>
    %84 = vector.broadcast %83 : vector<8x1xf32> to vector<8x8xf32>
    %85 = arith.subf %81, %84 : vector<8x8xf32>
    %86 = math.exp %85 : vector<8x8xf32>
    %cst_27 = arith.constant dense<0.000000e+00> : vector<8xf32>
    %87 = vector.multi_reduction <add>, %86, %cst_27 [1] : vector<8x8xf32> to vector<8xf32>
    %88 = vector.shape_cast %87 : vector<8xf32> to vector<8x1xf32>
    %89 = vector.broadcast %88 : vector<8x1xf32> to vector<8x8xf32>
    %90 = arith.divf %86, %89 : vector<8x8xf32>
    %cst_28 = arith.constant dense<0.000000e+00> : vector<8x8xf32>
    %91 = tpu.matmul %90, %76, %cst_28 {dimension_numbers = #tpu.dot_dimension_numbers<[1], [0], [0], [1], [0, 0, 1, 1], [], []>} : vector<8x8xf32>, vector<8x8xf32>, vector<8x8xf32> -> vector<8x8xf32>
    %92 = vector.extract_strided_slice %32 {offsets = [0, 24], sizes = [8, 8], strides = [1, 1]} : vector<8x32xf32> to vector<8x8xf32>
    %93 = vector.extract_strided_slice %33 {offsets = [0, 24], sizes = [8, 8], strides = [1, 1]} : vector<8x32xf32> to vector<8x8xf32>
    %94 = vector.extract_strided_slice %34 {offsets = [0, 24], sizes = [8, 8], strides = [1, 1]} : vector<8x32xf32> to vector<8x8xf32>
    %cst_29 = arith.constant dense<0.000000e+00> : vector<8x8xf32>
    %95 = tpu.matmul %93, %92, %cst_29 {dimension_numbers = #tpu.dot_dimension_numbers<[1], [1], [0], [0], [0, 0, 1, 0], [], []>} : vector<8x8xf32>, vector<8x8xf32>, vector<8x8xf32> -> vector<8x8xf32>
    %cst_30 = arith.constant 0.353553385 : f32
    %96 = vector.broadcast %cst_30 : f32 to vector<8x8xf32>
    %97 = arith.mulf %95, %96 : vector<8x8xf32>
    %cst_31 = arith.constant 0xFF800000 : f32
    %98 = vector.broadcast %cst_31 : f32 to vector<8x8xf32>
    %99 = arith.select %37, %97, %98 : vector<8x8xi1>, vector<8x8xf32>
    %cst_32 = arith.constant dense<0xFF800000> : vector<8xf32>
    %100 = vector.multi_reduction <maximumf>, %99, %cst_32 [1] : vector<8x8xf32> to vector<8xf32>
    %101 = vector.shape_cast %100 : vector<8xf32> to vector<8x1xf32>
    %102 = vector.broadcast %101 : vector<8x1xf32> to vector<8x8xf32>
    %103 = arith.subf %99, %102 : vector<8x8xf32>
    %104 = math.exp %103 : vector<8x8xf32>
    %cst_33 = arith.constant dense<0.000000e+00> : vector<8xf32>
    %105 = vector.multi_reduction <add>, %104, %cst_33 [1] : vector<8x8xf32> to vector<8xf32>
    %106 = vector.shape_cast %105 : vector<8xf32> to vector<8x1xf32>
    %107 = vector.broadcast %106 : vector<8x1xf32> to vector<8x8xf32>
    %108 = arith.divf %104, %107 : vector<8x8xf32>
    %cst_34 = arith.constant dense<0.000000e+00> : vector<8x8xf32>
    %109 = tpu.matmul %108, %94, %cst_34 {dimension_numbers = #tpu.dot_dimension_numbers<[1], [0], [0], [1], [0, 0, 1, 1], [], []>} : vector<8x8xf32>, vector<8x8xf32>, vector<8x8xf32> -> vector<8x8xf32>
    %110 = tpu.concatenate %55, %73, %91, %109 in 1 : vector<8x8xf32>, vector<8x8xf32>, vector<8x8xf32>, vector<8x8xf32> -> vector<8x32xf32>
    %c0_35 = arith.constant 0 : index
    %c0_36 = arith.constant 0 : index
    %111 = vector.load %arg5[%c0_35, %c0_36] : memref<48x48xf32, #tpu.memory_space<vmem>>, vector<48x48xf32>
    %112 = vector.extract_strided_slice %111 {offsets = [0, 0], sizes = [32, 32], strides = [1, 1]} : vector<48x48xf32> to vector<32x32xf32>
    %cst_37 = arith.constant dense<0.000000e+00> : vector<8x32xf32>
    %113 = tpu.matmul %110, %112, %cst_37 {dimension_numbers = #tpu.dot_dimension_numbers<[1], [1], [0], [0], [0, 0, 1, 0], [], []>} : vector<8x32xf32>, vector<32x32xf32>, vector<8x32xf32> -> vector<8x32xf32>
    %c0_38 = arith.constant 0 : index
    %c0_39 = arith.constant 0 : index
    %c0_40 = arith.constant 0 : index
    %114 = vector.load %arg6[%c0_38, %c0_39, %c0_40] : memref<1x8x32xf32, #tpu.memory_space<vmem>>, vector<1x8x32xf32>
    %115 = vector.shape_cast %114 : vector<1x8x32xf32> to vector<8x32xf32>
    %116 = vector.shape_cast %113 : vector<8x32xf32> to vector<1x8x32xf32>
    tpu.vector_store %arg6[%c0_38, %c0_39, %c0_40], %116 {strides = array<i32>} : memref<1x8x32xf32, #tpu.memory_space<vmem>>, vector<1x8x32xf32>,
    return
  }
  func.func @transform_0(%arg0: i32) -> (i32, i32, i32) {
    %c0_i32 = arith.constant 0 : i32
    %c0_i32_0 = arith.constant 0 : i32
    %c0_i32_1 = arith.constant 0 : i32
    return %arg0, %c0_i32, %c0_i32_0 : i32, i32, i32
  }
  func.func @transform_1(%arg0: i32) -> (i32, i32, i32) {
    %c0_i32 = arith.constant 0 : i32
    %c0_i32_0 = arith.constant 0 : i32
    %c0_i32_1 = arith.constant 0 : i32
    %c0_i32_2 = arith.constant 0 : i32
    return %c0_i32, %c0_i32_0, %c0_i32_1 : i32, i32, i32
  }
  func.func @transform_2(%arg0: i32) -> (i32, i32, i32) {
    %c0_i32 = arith.constant 0 : i32
    %c0_i32_0 = arith.constant 0 : i32
    %c0_i32_1 = arith.constant 0 : i32
    %c0_i32_2 = arith.constant 0 : i32
    return %c0_i32, %c0_i32_0, %c0_i32_1 : i32, i32, i32
  }
  func.func @transform_3(%arg0: i32) -> (i32, i32, i32) {
    %c0_i32 = arith.constant 0 : i32
    %c0_i32_0 = arith.constant 0 : i32
    %c0_i32_1 = arith.constant 0 : i32
    %c0_i32_2 = arith.constant 0 : i32
    return %c0_i32, %c0_i32_0, %c0_i32_1 : i32, i32, i32
  }
  func.func @transform_4(%arg0: i32) -> (i32, i32) {
    %c0_i32 = arith.constant 0 : i32
    %c0_i32_0 = arith.constant 0 : i32
    %c0_i32_1 = arith.constant 0 : i32
    return %c0_i32, %c0_i32_0 : i32, i32
  }
  func.func @transform_5(%arg0: i32) -> (i32, i32, i32) {
    %c0_i32 = arith.constant 0 : i32
    %c0_i32_0 = arith.constant 0 : i32
    %c0_i32_1 = arith.constant 0 : i32
    return %arg0, %c0_i32, %c0_i32_0 : i32, i32, i32
  }
}

</mosaic_0001>

<bundles_post_ra>
// kernel: tpu_custom_call.1
= control target key start
LH: loop header
LB: loop body
LE: loop exit
PB: predicated region body
PF: predicated region fallthrough
CT: control target
= control target key end

     0   :  { %10 = vsyncpa [#allocation3], 0  ;;  %s1829_s0 = inlined_call_operand.vmem [shape: f32[2,8,48], index: 0, kind: input, shape index: {}]   ;;  %s1830_s1 = inlined_call_operand.vmem [shape: f32[4,12,48], index: 1, kind: input, shape index: {}]   ;;  %s1831_s2 = inlined_call_operand.vmem [shape: f32[4,12,48], index: 2, kind: input, shape index: {}]   ;;  %s1832_s3 = inlined_call_operand.vmem [shape: f32[4,12,48], index: 3, kind: input, shape index: {}]   ;;  %s1833_s4 = inlined_call_operand.vmem [shape: f32[48,48], index: 4, kind: input, shape index: {}]   ;;  %s1834_s5 = inlined_call_operand.hbm [shape: f32[2,8,32], index: 5, kind: output, shape index: {}]  }
   0x1   :  { %12 = vsyncpa [#allocation3 + $0x1], 0  ;;  %s1564_s18 = smov 0   ;;  %s1566_s19 = smov 0  }
   0x2   :  { %s1568_s20 = smov 0   ;;  %s1570_s21 = smov 0  }
   0x3 LB: > { %s1585_s22 = sadd.s32 4294967295, %s1514_s21   ;;  %s1196_s23 = sadd.s32 4294967294, %s1514_s21   ;;  %s1514_s21 = sphi %s1570_s21, %s1842_s21   ;;  %s1510_s20 = sphi %s1568_s20, %s1841_s20   ;;  %s1506_s19 = sphi %s1566_s19, %s1840_s19   ;;  %s1502_s18 = sphi %s1564_s18, %s1839_s18  }
   0x4   : > { %s1589_s24 = sadd.s32 1, %s1514_s21   ;;  %s135_s25 = sadd.s32 1, %s1510_s20 }
   0x5   : > { %s132_s26 = ssub.s32 %s1514_s21, %s1589_s24  ;;  %p145_p0 = scmp.ne.s32.totalorder %s1510_s20, %s1506_s19 }
   0x6   : > { %p133_p1 = scmp.eq.s32.totalorder %s132_s26, 0  ;;  %p146_p2 = scmp.eq.s32.totalorder %s1585_s22, 1 }
   0x7   : > { %p151_p3 = scmp.ne.s32.totalorder %s1506_s19, %s1502_s18  ;;  %p152_p4 = scmp.eq.s32.totalorder %s1196_s23, 1 }
   0x8   : > { %s1600_s27 = scalar_select %p133_p1, %s1510_s20, %s135_s25  }
   0x9   : > { %p1602_p5 = por %p146_p2, %p145_p0  ;;  %p1606_p6 = por %p152_p4, %p151_p3 }
   0xa   : > { %p1199_p7 = scmp.ge.s32.totalorder %s1514_s21, 1  ;;  %p189_p8 = scmp.lt.s32.totalorder %s1514_s21, 3 }
   0xc   : > { %p190_p9 = pnand %p1199_p7, %p189_p8 }
   0xd   : > { %v221_v0 = vld [vmem:[%s1830_s1] sm:$0xff] (!%p190_p9)  ;;  %v222_v1 = vld [vmem:[%s1830_s1 + $0x10] sm:$0xff] (!%p190_p9)  ;;  %vm233_vm0 = vcmask (!%p190_p9), 261120   ;;  %v1516_v2 = vmov (!%p190_p9), 0.0|0.0   ;;  %vm1517_vm2 = vmmov (!%p190_p9), 0   ;;  %v1518_v5 = vmov (!%p190_p9), 0.0  }
   0xe   : > { %193 = sbr.rel (%p190_p9) target bundleno = 3072 (0xc00), region = 40  ;;  %1348 = vmatprep.subr.bf16.mxu0 (!%p190_p9), %v1516_v2  ;;  %v1349_v3 = vpack.c.bf16 (!%p190_p9), %v222_v1, %v221_v0  ;;  %vm1621_vm1 = vmpackc.low (!%p190_p9), %vm233_vm0, %vm233_vm0  ;;  %1294 = vmatprep.mubr.msk.f32.mxu0 (!%p190_p9), %vm1517_vm2, %v1518_v5  ;;  %v223_v6 = vld [vmem:[%s1830_s1 + $0x20] sm:$0xff] (!%p190_p9)  ;;  %v224_v7 = vld [vmem:[%s1830_s1 + $0x30] sm:$0xff] (!%p190_p9)  ;;  %p216_p10 = scmp.lt.s32.totalorder (!%p190_p9), %s1585_s22, 1  ;;  %vm351_vm3 = vcmask (!%p190_p9), 64512   ;;  %v343_v26 = vlaneseq (!%p190_p9)  ;;  %vm1029_vm5 = vcmask (!%p190_p9), 130048  }
   0xf   : > { %1297 = vmatprep.subr.mxu1 (!%p190_p9), %v1518_v5  ;;  %1299 = vmatprep.mubr.msk.f32.mxu1 (!%p190_p9), %vm1517_vm2, %v1518_v5  ;;  %v1353_v8 = vpack.c.bf16 (!%p190_p9), %v224_v7, %v223_v6  ;;  %v225_v9 = vld [vmem:[%s1831_s2] sm:$0xff] (!%p190_p9)  ;;  %v226_v10 = vld [vmem:[%s1831_s2 + $0x10] sm:$0xff] (!%p190_p9)  ;;  %s1519_s23 = smov (!%p190_p9), 64   ;;  %s1520_s25 = smov (!%p190_p9), 96   ;;  %vm1031_vm6 = vcmask (!%p190_p9), 195584  }
  0x10   : > { %1351 = vmatpush3.bf16.xpose.msk.msra.mxu0 (!%p190_p9), %vm1621_vm1, %v1349_v3  ;;  %v1357_v11 = vpack.c.bf16 (!%p190_p9), %v226_v10, %v225_v9  ;;  %v227_v12 = vld [vmem:[%s1831_s2 + $0x20] sm:$0xff] (!%p190_p9)  ;;  %v228_v13 = vld [vmem:[%s1831_s2 + $0x30] sm:$0xff] (!%p190_p9)  ;;  %s1521_s26 = smov (!%p190_p9), 120   ;;  %v1695_v27 = vshrl.u32 (!%p190_p9), %v343_v26, 7  ;;  %v1697_v28 = vand.u32 (!%p190_p9), 127, %v343_v26  ;;  %s1522_s30 = smov (!%p190_p9), 56  }
  0x11   : > { %1352 = vmatprep.subr.bf16.mxu0 (!%p190_p9), %v1516_v2  ;;  %v1361_v14 = vpack.c.bf16 (!%p190_p9), %v228_v13, %v227_v12  ;;  %v229_v15 = vld [vmem:[%s1832_s3] sm:$0xff] (!%p190_p9)  ;;  %v230_v16 = vld [vmem:[%s1832_s3 + $0x10] sm:$0xff] (!%p190_p9)  ;;  %s1523_s6 = smov (!%p190_p9), 112   ;;  %s1524_s7 = smov (!%p190_p9), 88  }
  0x12   : > { %v1365_v17 = vpack.c.bf16 (!%p190_p9), %v230_v16, %v229_v15  ;;  %v231_v18 = vld [vmem:[%s1832_s3 + $0x20] sm:$0xff] (!%p190_p9)  ;;  %v232_v19 = vld [vmem:[%s1832_s3 + $0x30] sm:$0xff] (!%p190_p9)  ;;  %vm347_vm4 = vcmp.ge.s32.totalorder (!%p190_p9), %v1695_v27, %v1697_v28  ;;  %s1525_s8 = smov (!%p190_p9), 80   ;;  %s1526_s9 = smov (!%p190_p9), 48  }
  0x13   : > { %v1369_v20 = vpack.c.bf16 (!%p190_p9), %v232_v19, %v231_v18  ;;  %s1527_s10 = smov (!%p190_p9), 104   ;;  %s1528_s11 = smov (!%p190_p9), 72  }
  0x14   : > { %s1529_s12 = smov (!%p190_p9), 40  }
  0x15   : > { %s217_s13 = scalar_select %p216_p10, %s1585_s22, 1 }
  0x17   : > { %s1201_s14 = sshll.u32 %s217_s13, 3  ;;  %s1530_s13 = smov 8  }
  0x18   : > { %1355 = vmatpush3.bf16.xpose.msk.msra.mxu0 %vm1621_vm1, %v1353_v8  ;;  %s219_s17 = scalar_lea.vmem %s1829_s0, %s1201_s14  ;;  %s1531_s14 = smov 16  }
  0x19   : > { %1356 = vmatprep.subr.bf16.mxu0 %v1516_v2  ;;  %v220_v21 = vld [vmem:[%s219_s17] sm:$0xff] }
  0x20   : > { %1359 = vmatpush3.bf16.xpose.msk.msra.mxu0 %vm1621_vm1, %v1357_v11 }
  0x21   : > { %1360 = vmatprep.subr.bf16.mxu0 %v1516_v2 }
  0x28   : > { %1363 = vmatpush3.bf16.xpose.msk.msra.mxu0 %vm1621_vm1, %v1361_v14 }
  0x29   : > { %1364 = vmatprep.subr.bf16.mxu0 %v1516_v2 }
  0x30   : > { %1367 = vmatpush3.bf16.xpose.msk.msra.mxu0 %vm1621_vm1, %v1365_v17 }
  0x31   : > { %1368 = vmatprep.subr.bf16.mxu0 %v1516_v2 }
  0x38   : > { %1371 = vmatpush3.bf16.xpose.msk.msra.mxu0 %vm1621_vm1, %v1369_v20 }
  0x3f   : > { %1295 = vmatmul.mubr.msk.f32.vlgmr.msra.gmra.mrb[0].mxu0 %vm233_vm0, %v220_v21 }
 0x112   : > { %v1683_v22 = vpop.f32.mrb[0].mxu0 }
 0x113   : > { %439 = vrot.lane.b32.xlu1 %v1683_v22, %s1519_s23  ;;  %349 = vrot.lane.b32.xlu0 %v1683_v22, %s1520_s25  ;;  %v1296_v23 = vpop.f32.mrb[1].mxu0 }
 0x114   : > { %1298 = vmatpush3.xpose.msk.msra.mxu1 %vm351_vm3, %v1683_v22 }
 0x115   : > { %1302 = vmatprep.subr.mxu1 %v1518_v5 }
 0x117   : > { %517 = vrot.lane.b32.xlu1 %v1683_v22, %s1521_s26 }
 0x185   : > { %v440_v24 = vpop.permute.xlu1 %439  ;;  %v350_v25 = vpop.permute.xlu0 %349 }
 0x186   : > { %1300 = vmatmul.mubr.msk.f32.vlgmr.msra.gmra.mrb[0].mxu1 %vm351_vm3, %v350_v25 }
 0x187   : > { %1303 = vmatpush3.msra.mxu1 %v440_v24  ;;  %1304 = vmatprep.mubr.msk.f32.mxu1 %vm1517_vm2, %v1518_v5 }
 0x188   : > { %1307 = vmatprep.subr.mxu1 %v1518_v5 }
 0x189   : > { %v518_v39 = vpop.permute.xlu1 %517 }
 0x259   : > { %v422_v29 = vpop.f32.mrb[0].mxu1 }
 0x25a   : > { %v426_v30 = vmul.f32 0.35355338, %v422_v29  ;;  %v1301_v31 = vpop.f32.mrb[1].mxu1 }
 0x25c   : > { %v427_v32 = vsel %vm347_vm4, %v426_v30, -inf }
 0x25d   : > { %v428_v33 = vsel %vm351_vm3, %v427_v32, -inf }
 0x25e   : > { %429 = vmax.xlane.f32.xlu0 %v428_v33 }
 0x274   : > { %606 = vrot.lane.b32.xlu0 %v1683_v22, %s1522_s30 }
 0x278   : > { %684 = vrot.lane.b32.xlu0 %v1683_v22, %s1523_s6 }
 0x2eb   : > { %v430_v34 = vpop.xlane.xlu0 %429 }
 0x2ec   : > { %v431_v35 = vsub.f32 %v427_v32, %v430_v34 }
 0x2ee   : > { %v432_v36 = vmul.f32 1.442695, %v431_v35 }
 0x2ef   : > { %v607_v44 = vpop.permute.xlu0 %606 }
 0x2f0   : > { %1436 = vpow2.f32 %v432_v36  ;;  %v1034_v36 = vld [vmem:[%s1833_s4 + $0x8] sm:$0xff] }
 0x2f3   : > { %v685_v57 = vpop.permute.xlu0 %684 }
 0x2fa   : > { %v1437_v37 = vpop.eup %1436 }
 0x2fb   : > { %v434_v38 = vsel %vm351_vm3, %v1437_v37, 0.0 }
 0x2fc   : > { %435 = vadd.xlane.f32.xlu1 %v434_v38  ;;  %v1035_v38 = vld [vmem:[%s1833_s4 + $0x10] sm:$0xff] }
 0x30d   : > { %515 = vrot.lane.b32.xlu1 %v1683_v22, %s1524_s7  ;;  %s1532_s7 = smov 24  }
 0x389   : > { %v436_v40 = vpop.xlane.xlu1 %435 }
 0x38a   : > { %1438 = vrcp.f32 %v436_v40 }
 0x38d   : > { %v516_v43 = vpop.permute.xlu1 %515 }
 0x394   : > { %v1439_v41 = vpop.eup %1438 }
 0x395   : > { %v438_v42 = vmul.f32 %v1439_v41, %v1437_v37 }
 0x397   : > { %1305 = vmatmul.mubr.msk.f32.vlgmr.msra.gmra.mrb[2].mxu1 %vm351_vm3, %v438_v42 }
 0x398   : > { %1308 = vmatpush3.xpose.msk.msra.mxu1 %vm351_vm3, %v518_v39  ;;  %1309 = vmatprep.mubr.msk.f32.mxu1 %vm1517_vm2, %v1518_v5 }
 0x399   : > { %1312 = vmatprep.subr.mxu1 %v1518_v5 }
 0x39b   : > { %1310 = vmatmul.mubr.msk.f32.vlgmr.msra.gmra.mrb[4].mxu1 %vm351_vm3, %v516_v43 }
 0x39c   : > { %1313 = vmatpush3.msra.mxu1 %v607_v44  ;;  %1314 = vmatprep.mubr.msk.f32.mxu1 %vm1517_vm2, %v1518_v5 }
 0x39d   : > { %1317 = vmatprep.subr.mxu1 %v1518_v5 }
 0x46a   : > { %v1718_v45 = vpop.f32.mrb[2].mxu1 }
 0x46b   : > { %v1306_v46 = vpop.f32.mrb[3].mxu1 }
 0x46e   : > { %v589_v47 = vpop.f32.mrb[4].mxu1 }
 0x46f   : > { %v593_v48 = vmul.f32 0.35355338, %v589_v47  ;;  %v1311_v49 = vpop.f32.mrb[5].mxu1 }
 0x471   : > { %v594_v50 = vsel %vm347_vm4, %v593_v48, -inf }
 0x472   : > { %v595_v51 = vsel %vm351_vm3, %v594_v50, -inf }
 0x473   : > { %596 = vmax.xlane.f32.xlu1 %v595_v51 }
 0x500   : > { %v597_v52 = vpop.xlane.xlu1 %596 }
 0x501   : > { %v598_v53 = vsub.f32 %v594_v50, %v597_v52 }
 0x503   : > { %v599_v54 = vmul.f32 1.442695, %v598_v53 }
 0x505   : > { %1440 = vpow2.f32 %v599_v54 }
 0x50f   : > { %v1441_v55 = vpop.eup %1440 }
 0x510   : > { %v601_v56 = vsel %vm351_vm3, %v1441_v55, 0.0 }
 0x511   : > { %602 = vadd.xlane.f32.xlu0 %v601_v56 }
 0x527   : > { %682 = vrot.lane.b32.xlu0 %v1683_v22, %s1525_s8  ;;  %s213_s8 = sand.u32 1, %s1506_s19  }
 0x528   : > { %s1124_s16 = scalar_lea.sflag [#allocation3], %s213_s8 }
 0x59e   : > { %v603_v58 = vpop.xlane.xlu0 %602 }
 0x59f   : > { %1442 = vrcp.f32 %v603_v58 }
 0x5a2   : > { %v683_v61 = vpop.permute.xlu0 %682 }
 0x5a9   : > { %v1443_v59 = vpop.eup %1442 }
 0x5aa   : > { %v605_v60 = vmul.f32 %v1443_v59, %v1441_v55 }
 0x5ac   : > { %1315 = vmatmul.mubr.msk.f32.vlgmr.msra.gmra.mrb[6].mxu1 %vm351_vm3, %v605_v60 }
 0x5ad   : > { %1318 = vmatpush3.xpose.msk.msra.mxu1 %vm351_vm3, %v685_v57  ;;  %1319 = vmatprep.mubr.msk.f32.mxu1 %vm1517_vm2, %v1518_v5 }
 0x5ae   : > { %1322 = vmatprep.subr.mxu1 %v1518_v5 }
 0x5b0   : > { %1320 = vmatmul.mubr.msk.f32.vlgmr.msra.gmra.mrb[8].mxu1 %vm351_vm3, %v683_v61 }
 0x5b1   : > { %1324 = vmatprep.mubr.msk.f32.mxu1 %vm1517_vm2, %v1518_v5 }
 0x67f   : > { %v678_v62 = vpop.f32.mrb[6].mxu1 }
 0x680   : > { %v1316_v63 = vpop.f32.mrb[7].mxu1 }
 0x683   : > { %v756_v0 = vpop.f32.mrb[8].mxu1 }
 0x684   : > { %v760_v1 = vmul.f32 0.35355338, %v756_v0  ;;  %v1321_v3 = vpop.f32.mrb[9].mxu1 }
 0x686   : > { %v761_v6 = vsel %vm347_vm4, %v760_v1, -inf }
 0x687   : > { %v762_v7 = vsel %vm351_vm3, %v761_v6, -inf }
 0x688   : > { %763 = vmax.xlane.f32.xlu1 %v762_v7 }
 0x699   : > { %773 = vrot.lane.b32.xlu1 %v1683_v22, %s1526_s9  ;;  %s1200_s9 = sshll.u32 %s213_s8, 3 }
 0x69d   : > { %851 = vrot.lane.b32.xlu1 %v1683_v22, %s1527_s10  ;;  %s1233_s10 = sshll.u32 %s1585_s22, 7  ;;  %s1533_s22 = smov [#allocation2]  }
 0x69e   : > { %s1786_s15 = scalar_lea.hbm %s1834_s5, %s1233_s10  ;;  %s1456_s23 = sshll.u32 %s1533_s22, 4  ;;  %s1457_s23 = int_to_ptr.vmem [resolvable:$false] %s1456_s23 }
 0x69f   : > { %s1458_s25 = scalar_lea.vmem %s1457_s23, 256 }
 0x6a1   : > { %849 = vrot.lane.b32.xlu1 %v1683_v22, %s1528_s11  ;;  %s215_s11 = scalar_lea.vmem [#allocation2], %s1200_s9 }
 0x715   : > { %v764_v8 = vpop.xlane.xlu1 %763 }
 0x716   : > { %v765_v9 = vsub.f32 %v761_v6, %v764_v8 }
 0x718   : > { %v766_v10 = vmul.f32 1.442695, %v765_v9 }
 0x719   : > { %v774_v11 = vpop.permute.xlu1 %773 }
 0x71a   : > { %1444 = vpow2.f32 %v766_v10  ;;  %1323 = vmatpush3.msra.mxu1 %v774_v11 }
 0x71b   : > { %1327 = vmatprep.subr.mxu1 %v1518_v5 }
 0x71d   : > { %v852_v16 = vpop.permute.xlu1 %851 }
 0x721   : > { %v850_v18 = vpop.permute.xlu1 %849 }
 0x724   : > { %v1445_v12 = vpop.eup %1444 }
 0x725   : > { %v768_v13 = vsel %vm351_vm3, %v1445_v12, 0.0 }
 0x726   : > { %769 = vadd.xlane.f32.xlu0 %v768_v13 }
 0x7b3   : > { %v770_v14 = vpop.xlane.xlu0 %769 }
 0x7b4   : > { %1446 = vrcp.f32 %v770_v14 }
 0x7be   : > { %v1447_v15 = vpop.eup %1446 }
 0x7bf   : > { %v772_v17 = vmul.f32 %v1447_v15, %v1445_v12 }
 0x7c1   : > { %1325 = vmatmul.mubr.msk.f32.vlgmr.msra.gmra.mrb[10].mxu1 %vm351_vm3, %v772_v17 }
 0x7c2   : > { %1328 = vmatpush3.xpose.msk.msra.mxu1 %vm351_vm3, %v852_v16  ;;  %1329 = vmatprep.mubr.msk.f32.mxu1 %vm1517_vm2, %v1518_v5 }
 0x7c3   : > { %1332 = vmatprep.subr.mxu1 %v1518_v5 }
 0x7c5   : > { %1330 = vmatmul.mubr.msk.f32.vlgmr.msra.gmra.mrb[12].mxu1 %vm351_vm3, %v850_v18 }
 0x7c6   : > { %1334 = vmatprep.mubr.msk.f32.mxu1 %vm1517_vm2, %v1518_v5 }
 0x894   : > { %v845_v19 = vpop.f32.mrb[10].mxu1 }
 0x895   : > { %v1326_v20 = vpop.f32.mrb[11].mxu1 }
 0x898   : > { %v923_v21 = vpop.f32.mrb[12].mxu1 }
 0x899   : > { %v927_v23 = vmul.f32 0.35355338, %v923_v21  ;;  %v1331_v24 = vpop.f32.mrb[13].mxu1 }
 0x89b   : > { %v928_v25 = vsel %vm347_vm4, %v927_v23, -inf }
 0x89c   : > { %v929_v26 = vsel %vm351_vm3, %v928_v25, -inf }
 0x89d   : > { %930 = vmax.xlane.f32.xlu1 %v929_v26 }
 0x92a   : > { %v931_v29 = vpop.xlane.xlu1 %930 }
 0x92b   : > { %v932_v30 = vsub.f32 %v928_v25, %v931_v29 }
 0x92d   : > { %v933_v31 = vmul.f32 1.442695, %v932_v30 }
 0x92f   : > { %1448 = vpow2.f32 %v933_v31 }
 0x939   : > { %v1449_v32 = vpop.eup %1448 }
 0x93a   : > { %v935_v33 = vsel %vm351_vm3, %v1449_v32, 0.0 }
 0x93b   : > { %936 = vadd.xlane.f32.xlu0 %v935_v33 }
 0x951   : > { %940 = vrot.lane.b32.xlu0 %v1683_v22, %s1529_s12  ;;  %v1033_v22 = vld [vmem:[%s1833_s4] sm:$0xff]  ;;  %s1137_s12 = sshll.u32 %s215_s11, 4  ;;  %s1788_s12 = int_to_ptr.vmem [resolvable:$true] %s1137_s12 }
 0x952   : > { %v1373_v37 = vpack.c.bf16 %v1034_v36, %v1033_v22  ;;  %s1452_s17 = scalar_lea.vmem %s1788_s12, 128  ;;  %p1459_p0 = scmp.lt.s32.totalorder %s1788_s12, %s1457_s23 }
 0x953   : > { %p1453_p11 = scmp.ne.s32.totalorder %s1788_s12, %s1452_s17  ;;  %p1460_p1 = scmp.lt.s32.totalorder %s1458_s25, %s1452_s17 }
 0x955   : > { %1017 = vrot.lane.b32.xlu0 %v678_v62, %s1530_s13  ;;  %p1454_p12 = pnand %p1453_p11, %p1602_p5  ;;  %p1461_p2 = por %p1460_p1, %p1459_p0 }
 0x957   : > { %p1455_p13 = pneg %p1454_p12 }
 0x959   : > { %1021 = vrot.lane.b32.xlu0 %v845_v19, %s1531_s14  ;;  %p1462_p3 = pnand %p1461_p2, %p1455_p13 }
 0x9c8   : > { %v937_v27 = vpop.xlane.xlu0 %936 }
 0x9c9   : > { %1450 = vrcp.f32 %v937_v27 }
 0x9cc   : > { %v941_v28 = vpop.permute.xlu0 %940 }
 0x9cd   : > { %1333 = vmatpush3.msra.mxu1 %v941_v28 }
 0x9ce   : > { %1372 = vmatprep.subr.bf16.mxu1 %v1516_v2 }
 0x9d0   : > { %v1018_v42 = vpop.permute.xlu0 %1017 }
 0x9d1   : > { %v1028_v43 = vsel %vm351_vm3, %v1718_v45, %v1018_v42 }
 0x9d3   : > { %v1451_v34 = vpop.eup %1450 }
 0x9d4   : > { %v939_v35 = vmul.f32 %v1451_v34, %v1449_v32 }
 0x9d6   : > { %1335 = vmatmul.mubr.msk.f32.vlgmr.msra.gmra.mrb[14].mxu1 %vm351_vm3, %v939_v35 }
 0x9d7   : > { %1345 = vmatprep.mubr.msk.f32.mxu1 %vm1517_vm2, %v1518_v5  ;;  %1375 = vmatpush3.bf16.xpose.msk.msra.mxu1 %vm1621_vm1, %v1373_v37  ;;  %v1036_v5 = vld [vmem:[%s1833_s4 + $0x18] sm:$0xff] }
 0x9d8   : > { %1376 = vmatprep.subr.bf16.mxu1 %v1516_v2  ;;  %v1377_v39 = vpack.c.bf16 %v1036_v5, %v1035_v38  ;;  %v1022_v2 = vpop.permute.xlu0 %1021 }
 0x9d9   : > { %v1030_v44 = vsel %vm1029_vm5, %v1028_v43, %v1022_v2 }
 0x9df   : > { %1379 = vmatpush3.bf16.xpose.msk.msra.mxu1 %vm1621_vm1, %v1377_v39 }
 0xaa9   : > { %v1012_v40 = vpop.f32.mrb[14].mxu1 }
 0xaaa   : > { %1025 = vrot.lane.b32.xlu1 %v1012_v40, %s1532_s7  ;;  %v1336_v41 = vpop.f32.mrb[15].mxu1 }
 0xb1c   : > { %v1026_v46 = vpop.permute.xlu1 %1025 }
 0xb1d   : > { %v1032_v47 = vsel %vm1031_vm6, %v1030_v44, %v1026_v46 }
 0xb1e   : > { %1346 = vmatmul.mubr.msk.f32.vlgmr.msra.gmra.mrb[16].mxu1 %vm233_vm0, %v1032_v47 }
 0xbf1   : > { %v1118_v4 = vpop.f32.mrb[16].mxu1 }
 0xbf2   : > { %1122 = vst.msk [vmem:[%s215_s11] sm:$0xff] %vm233_vm0, %v1118_v4  ;;  %v1347_v45 = vpop.f32.mrb[17].mxu1 }
 0xbf3   : > { %1465 = shalt.err (!%p1462_p3)
}
 0xbf4   : > { %s1466_s26 = scalar_lea.hbm %s1786_s15, 128  ;;  %s1470_s7 = scalar_lea.hbm %s1834_s5, 256 }
 0xbf5   : > { %p1467_p4 = scmp.ne.s32.totalorder %s1786_s15, %s1466_s26  ;;  %p1471_p9 = scmp.lt.u32.totalorder %s1786_s15, %s1834_s5 }
 0xbf6   : > { %p1472_p10 = scmp.lt.u32.totalorder %s1470_s7, %s1466_s26  ;;  %p1474_p12 = scmp.lt.u32.totalorder %s1466_s26, %s1786_s15 }
 0xbf7   : > { %p1468_p7 = pnand %p1467_p4, %p1602_p5 }
 0xbf8   : > { %p1473_p11 = por %p1472_p10, %p1471_p9 }
 0xbf9   : > { %p1469_p8 = pneg %p1468_p7 }
 0xbfa   : > { %p1475_p13 = por %p1474_p12, %p1473_p11 }
 0xbfc   : > { %p1476_p0 = pnand %p1475_p13, %p1469_p8 }
 0xbfe   : > { %1479 = shalt.err (!%p1476_p0)
}
 0xbff   : > { %1380 = dma.vmem_to_hbm [thread:$0]  (%p1602_p5), %s1788_s12, 128, %s1786_s15, %s1124_s16  }
 0xc00 PF: > { %p1386_p1 = scmp.ge.s32.totalorder %s1514_s21, 2  ;;  %s1149_s10 = sand.u32 1, %s1502_s18  }
 0xc01   : > { %s1150_s11 = scalar_lea.sflag [#allocation3], %s1149_s10 }
 0xc02   : > { %p1383_p2 = pnand %p1386_p1, %p1606_p6 }
 0xc04   : > { %1497 = dma.done.wait (!%p1383_p2), %s1150_s11, 128  }
 0xc05   : > { %1499 = vsyncadd (!%p1383_p2), %s1150_s11, 4294967168  ;;  %p15_p3 = scmp.ge.s32.totalorder %s1589_s24, 4   ;;  %s1839_s18 = smov %s1506_s19 }
 0xc06   : > { %s1840_s19 = smov %s1510_s20  ;;  %s1841_s20 = smov %s1600_s27 }
 0xc07   : > { %s1842_s21 = smov %s1589_s24  ;;  %17 = sbr.rel (!%p15_p3) target bundleno = 3 (0x3), region = 75 }
 0xc0e   :  { %1155 = vsyncpa [#allocation3], 1 }
 0xc0f   :  { %1157 = vsyncpa [#allocation3 + $0x1], 1 }

</bundles_post_ra>
